<compile_context>
chip_gen: v7x
topology: tpu7x:2x2x1
jax: 0.10.0
libtpu: 0.0.40
codegen_flags: <defaults>
</compile_context>

<pallas_src>
import functools

import numpy as np
import jax
import jax.numpy as jnp
from jax import lax
from jax.experimental import pallas as pl
from jax.experimental.pallas import tpu as pltpu

_LANE = 128
_SUBLANE = 8
_MAX_ROWS = 256   # rows of 128 lanes per spatial tile -> 32768 lanes / block


def _disp_init_kernel(seed_ref, min_ref, max_ref, noise_ref, interval_ref):
    """One (batch, spatial-tile) block.

    seed_ref:          SMEM scalar prefetch, (1,) int32
    min_ref, max_ref:  VMEM blocks (1, R, 128)
    noise_ref:         VMEM block (1, D, R, 128)  -- uniform [0, 1)
    interval_ref:      VMEM block (1, D, R, 128)  -- min + (max-min)*(d+1)/(D+1)
    """
    b = pl.program_id(0)
    t = pl.program_id(1)
    n_tiles = pl.num_programs(1)
    _, D, R, L = noise_ref.shape

    # Hash constants as np scalars (literalable -> never become captured
    # jaxpr constants, unlike module-level jnp arrays).
    m1 = np.uint32(0x7FEB352D)
    m2 = np.uint32(0x846CA68B)
    one_exp = np.uint32(0x3F800000)

    # Per-block counter offset: unique stream per (batch, tile). int32
    # wraparound for huge B*H*W is statistically benign (values are hashed).
    block_id = b * n_tiles + t
    off = seed_ref[0] + block_id * (D * R * L)

    # ---- deterministic part: shared per-block terms -------------------------
    mn = min_ref[0].astype(jnp.float32)            # (R, L)
    diff = max_ref[0].astype(jnp.float32) - mn     # (R, L)
    inv = 1.0 / (D + 1.0)

    # ---- stochastic part: per-element counters (minor-dim iotas only) -------
    row = lax.broadcasted_iota(jnp.int32, (R, L), 0)
    lane = lax.broadcasted_iota(jnp.int32, (R, L), 1)
    base = row * L + lane                          # (R, L) int32

    for d in range(D):
        # interval minimum disparity for this sample index
        scale = float((d + 1) * inv)               # trace-time constant
        interval_ref[0, d] = (mn + diff * scale).astype(interval_ref.dtype)

        # lowbias32-style mix in uint32 (logical shifts, no masks)
        cnt = base + (off + d * (R * L))           # int32, unique per element
        x = lax.bitcast_convert_type(cnt, jnp.uint32)
        x = x ^ (x >> 16)
        x = x * m1
        x = x ^ (x >> 15)
        x = x * m2
        x = x ^ (x >> 16)
        # mantissa trick: build a float in [1, 2) then subtract 1 -> [0, 1)
        fbits = (x >> 9) | one_exp
        u = lax.bitcast_convert_type(fbits, jnp.float32) - 1.0
        noise_ref[0, d] = u.astype(noise_ref.dtype)


@functools.partial(jax.jit, static_argnames=("disparity_sample_number",))
def disparity_initialization(min_disparity, max_disparity, seed,
                             disparity_sample_number=12):
    """JAX/Pallas equivalent of DisparityInitialization.forward.

    min_disparity, max_disparity: (B, 1, H, W) float32
    seed: (1,) int32
    Returns (disparity_sample_noise, interval_min_disparity), each (B, D, H, W).
    """
    B, _, H, W = min_disparity.shape
    D = disparity_sample_number
    HW = H * W
    dtype = min_disparity.dtype
    itemsize = jnp.dtype(dtype).itemsize

    # Lane-dense + sublane-dense layout: (B, rows, 128) inputs,
    # (B, D, rows, 128) outputs, with per-tile rows R a multiple of 8.
    rows = pl.cdiv(HW, _LANE)
    n_tiles = pl.cdiv(rows, _MAX_ROWS)
    # v7x megacore: ensure >= 2 grid steps when the work can be split so both
    # TensorCores get a share.
    if B * n_tiles < 2 and rows > _SUBLANE:
        n_tiles = 2
    R = pl.cdiv(pl.cdiv(rows, n_tiles), _SUBLANE) * _SUBLANE
    rows_pad = R * n_tiles
    HW_pad = rows_pad * _LANE

    flat_min = min_disparity.reshape(B, HW)
    flat_max = max_disparity.reshape(B, HW)
    if HW_pad != HW:
        pad = ((0, 0), (0, HW_pad - HW))
        flat_min = jnp.pad(flat_min, pad)
        flat_max = jnp.pad(flat_max, pad)
    min3 = flat_min.reshape(B, rows_pad, _LANE)
    max3 = flat_max.reshape(B, rows_pad, _LANE)

    grid_spec = pltpu.PrefetchScalarGridSpec(
        num_scalar_prefetch=1,
        grid=(B, n_tiles),
        in_specs=[
            pl.BlockSpec((1, R, _LANE), lambda b, t, _s: (b, t, 0)),
            pl.BlockSpec((1, R, _LANE), lambda b, t, _s: (b, t, 0)),
        ],
        out_specs=[
            pl.BlockSpec((1, D, R, _LANE), lambda b, t, _s: (b, 0, t, 0)),
            pl.BlockSpec((1, D, R, _LANE), lambda b, t, _s: (b, 0, t, 0)),
        ],
    )

    cost = pl.CostEstimate(
        flops=15 * B * D * HW_pad,
        transcendentals=0,
        bytes_accessed=(2 * B * D * HW_pad + 2 * B * HW_pad) * itemsize,
    )

    noise, interval_min = pl.pallas_call(
        _disp_init_kernel,
        grid_spec=grid_spec,
        out_shape=(
            jax.ShapeDtypeStruct((B, D, rows_pad, _LANE), dtype),
            jax.ShapeDtypeStruct((B, D, rows_pad, _LANE), dtype),
        ),
        compiler_params=pltpu.CompilerParams(
            dimension_semantics=("parallel", "parallel")),
        cost_estimate=cost,
    )(seed, min3, max3)

    noise = noise.reshape(B, D, HW_pad)[:, :, :HW].reshape(B, D, H, W)
    interval_min = interval_min.reshape(B, D, HW_pad)[:, :, :HW].reshape(B, D, H, W)
    return noise, interval_min


def disparity_initialization_module(min_disparity, max_disparity, seed,
                                    disparity_sample_number=12):
    noise, interval_min = disparity_initialization(
        min_disparity, max_disparity, seed,
        disparity_sample_number=disparity_sample_number)
    disparity_sample_interval = 1.0 / (disparity_sample_number + 1)
    return noise, interval_min, disparity_sample_interval


if __name__ == "__main__":
    B, H, W = 2, 16, 16
    D = 12

    key = jax.random.PRNGKey(0)
    k1, k2 = jax.random.split(key)
    min_disp = jax.random.uniform(k1, (B, 1, H, W), jnp.float32, 0.0, 8.0)
    max_disp = min_disp + jax.random.uniform(k2, (B, 1, H, W), jnp.float32,
                                             16.0, 64.0)
    seed = jnp.array([0], dtype=jnp.int32)

    noise, interval_min, interval = disparity_initialization_module(
        min_disp, max_disp, seed, disparity_sample_number=D)
    jax.block_until_ready((noise, interval_min))

    # Reference check for the deterministic output.
    idx = (jnp.arange(1, D + 1, dtype=jnp.float32) / (D + 1)).reshape(1, D, 1, 1)
    ref_interval_min = min_disp + (max_disp - min_disp) * idx
    assert interval_min.shape == (B, D, H, W)
    assert jnp.allclose(interval_min, ref_interval_min, atol=1e-4, rtol=1e-4)

    # Noise must be uniform in [0, 1) with the right shape.
    assert noise.shape == (B, D, H, W)
    assert bool(jnp.all(noise >= 0.0)) and bool(jnp.all(noise < 1.0))
    assert abs(float(jnp.mean(noise)) - 0.5) < 0.05
    assert abs(interval - 1.0 / (D + 1)) < 1e-12

    print("KERNEL_OK")
</pallas_src>

<mosaic_0001>
module attributes {stable_mosaic.version = 11 : i64} {
  func.func @_disp_init_kernel(%arg0: i32, %arg1: i32, %arg2: memref<1xi32, #tpu.memory_space<smem>>, %arg3: memref<1x8x128xf32, #tpu.memory_space<vmem>>, %arg4: memref<1x8x128xf32, #tpu.memory_space<vmem>>, %arg5: memref<1x12x8x128xf32, #tpu.memory_space<vmem>>, %arg6: memref<1x12x8x128xf32, #tpu.memory_space<vmem>>) attributes {dimension_semantics = [#tpu.dimension_semantics<parallel>, #tpu.dimension_semantics<parallel>], iteration_bounds = array<i64: 2, 1>, scalar_prefetch = 1 : i64, scratch_operands = 0 : i64, tpu.core_type = #tpu.core_type<tc>, window_params = [{transform_indices = @transform_0, window_bounds = array<i64: 1, 8, 128>}, {transform_indices = @transform_1, window_bounds = array<i64: 1, 8, 128>}, {transform_indices = @transform_2, window_bounds = array<i64: 1, 12, 8, 128>}, {transform_indices = @transform_3, window_bounds = array<i64: 1, 12, 8, 128>}]} {
    %c1_i32 = arith.constant 1 : i32
    %0 = arith.muli %arg0, %c1_i32 : i32
    %1 = arith.addi %0, %arg1 : i32
    %c0 = arith.constant 0 : index
    %2 = memref.load %arg2[%c0] : memref<1xi32, #tpu.memory_space<smem>>
    %c12288_i32 = arith.constant 12288 : i32
    %3 = arith.muli %1, %c12288_i32 : i32
    %4 = arith.addi %2, %3 : i32
    %c0_0 = arith.constant 0 : index
    %c0_1 = arith.constant 0 : index
    %c0_2 = arith.constant 0 : index
    %5 = vector.load %arg3[%c0_0, %c0_1, %c0_2] : memref<1x8x128xf32, #tpu.memory_space<vmem>>, vector<1x8x128xf32>
    %6 = vector.shape_cast %5 : vector<1x8x128xf32> to vector<8x128xf32>
    %c0_3 = arith.constant 0 : index
    %c0_4 = arith.constant 0 : index
    %c0_5 = arith.constant 0 : index
    %7 = vector.load %arg4[%c0_3, %c0_4, %c0_5] : memref<1x8x128xf32, #tpu.memory_space<vmem>>, vector<1x8x128xf32>
    %8 = vector.shape_cast %7 : vector<1x8x128xf32> to vector<8x128xf32>
    %9 = arith.subf %8, %6 : vector<8x128xf32>
    %10 = tpu.iota {dimensions = array<i32: 0>} : vector<8x128xi32>
    %11 = tpu.iota {dimensions = array<i32: 1>} : vector<8x128xi32>
    %c128_i32 = arith.constant 128 : i32
    %12 = vector.broadcast %c128_i32 : i32 to vector<8x128xi32>
    %13 = arith.muli %10, %12 : vector<8x128xi32>
    %14 = arith.addi %13, %11 : vector<8x128xi32>
    %cst = arith.constant 0.0769230798 : f32
    %15 = vector.broadcast %cst : f32 to vector<8x128xf32>
    %16 = arith.mulf %9, %15 : vector<8x128xf32>
    %17 = arith.addf %6, %16 : vector<8x128xf32>
    %c0_6 = arith.constant 0 : index
    %c0_7 = arith.constant 0 : index
    %c0_8 = arith.constant 0 : index
    %c0_9 = arith.constant 0 : index
    %18 = vector.load %arg6[%c0_6, %c0_7, %c0_8, %c0_9] : memref<1x12x8x128xf32, #tpu.memory_space<vmem>>, vector<1x1x8x128xf32>
    %19 = vector.shape_cast %18 : vector<1x1x8x128xf32> to vector<8x128xf32>
    %20 = vector.shape_cast %17 : vector<8x128xf32> to vector<1x1x8x128xf32>
    tpu.vector_store %arg6[%c0_6, %c0_7, %c0_8, %c0_9], %20 {strides = array<i32>} : memref<1x12x8x128xf32, #tpu.memory_space<vmem>>, vector<1x1x8x128xf32>,
    %c0_i32 = arith.constant 0 : i32
    %21 = arith.addi %4, %c0_i32 : i32
    %22 = vector.broadcast %21 : i32 to vector<8x128xi32>
    %23 = arith.addi %14, %22 : vector<8x128xi32>
    %24 = tpu.bitcast %23 : vector<8x128xi32> -> vector<8x128xi32>
    %c16_i32 = arith.constant 16 : i32
    %25 = vector.broadcast %c16_i32 : i32 to vector<8x128xi32>
    %26 = arith.shrui %24, %25 : vector<8x128xi32>
    %27 = arith.xori %24, %26 : vector<8x128xi32>
    %c2146121005_i32 = arith.constant 2146121005 : i32
    %28 = vector.broadcast %c2146121005_i32 : i32 to vector<8x128xi32>
    %29 = arith.muli %27, %28 : vector<8x128xi32>
    %c15_i32 = arith.constant 15 : i32
    %30 = vector.broadcast %c15_i32 : i32 to vector<8x128xi32>
    %31 = arith.shrui %29, %30 : vector<8x128xi32>
    %32 = arith.xori %29, %31 : vector<8x128xi32>
    %c-2073254261_i32 = arith.constant -2073254261 : i32
    %33 = vector.broadcast %c-2073254261_i32 : i32 to vector<8x128xi32>
    %34 = arith.muli %32, %33 : vector<8x128xi32>
    %c16_i32_10 = arith.constant 16 : i32
    %35 = vector.broadcast %c16_i32_10 : i32 to vector<8x128xi32>
    %36 = arith.shrui %34, %35 : vector<8x128xi32>
    %37 = arith.xori %34, %36 : vector<8x128xi32>
    %c9_i32 = arith.constant 9 : i32
    %38 = vector.broadcast %c9_i32 : i32 to vector<8x128xi32>
    %39 = arith.shrui %37, %38 : vector<8x128xi32>
    %c1065353216_i32 = arith.constant 1065353216 : i32
    %40 = vector.broadcast %c1065353216_i32 : i32 to vector<8x128xi32>
    %41 = arith.ori %39, %40 : vector<8x128xi32>
    %42 = tpu.bitcast %41 : vector<8x128xi32> -> vector<8x128xf32>
    %cst_11 = arith.constant 1.000000e+00 : f32
    %43 = vector.broadcast %cst_11 : f32 to vector<8x128xf32>
    %44 = arith.subf %42, %43 : vector<8x128xf32>
    %c0_12 = arith.constant 0 : index
    %c0_13 = arith.constant 0 : index
    %c0_14 = arith.constant 0 : index
    %c0_15 = arith.constant 0 : index
    %45 = vector.load %arg5[%c0_12, %c0_13, %c0_14, %c0_15] : memref<1x12x8x128xf32, #tpu.memory_space<vmem>>, vector<1x1x8x128xf32>
    %46 = vector.shape_cast %45 : vector<1x1x8x128xf32> to vector<8x128xf32>
    %47 = vector.shape_cast %44 : vector<8x128xf32> to vector<1x1x8x128xf32>
    tpu.vector_store %arg5[%c0_12, %c0_13, %c0_14, %c0_15], %47 {strides = array<i32>} : memref<1x12x8x128xf32, #tpu.memory_space<vmem>>, vector<1x1x8x128xf32>,
    %cst_16 = arith.constant 0.15384616 : f32
    %48 = vector.broadcast %cst_16 : f32 to vector<8x128xf32>
    %49 = arith.mulf %9, %48 : vector<8x128xf32>
    %50 = arith.addf %6, %49 : vector<8x128xf32>
    %c0_17 = arith.constant 0 : index
    %c1 = arith.constant 1 : index
    %c0_18 = arith.constant 0 : index
    %c0_19 = arith.constant 0 : index
    %51 = vector.load %arg6[%c0_17, %c1, %c0_18, %c0_19] : memref<1x12x8x128xf32, #tpu.memory_space<vmem>>, vector<1x1x8x128xf32>
    %52 = vector.shape_cast %51 : vector<1x1x8x128xf32> to vector<8x128xf32>
    %53 = vector.shape_cast %50 : vector<8x128xf32> to vector<1x1x8x128xf32>
    tpu.vector_store %arg6[%c0_17, %c1, %c0_18, %c0_19], %53 {strides = array<i32>} : memref<1x12x8x128xf32, #tpu.memory_space<vmem>>, vector<1x1x8x128xf32>,
    %c1024_i32 = arith.constant 1024 : i32
    %54 = arith.addi %4, %c1024_i32 : i32
    %55 = vector.broadcast %54 : i32 to vector<8x128xi32>
    %56 = arith.addi %14, %55 : vector<8x128xi32>
    %57 = tpu.bitcast %56 : vector<8x128xi32> -> vector<8x128xi32>
    %c16_i32_20 = arith.constant 16 : i32
    %58 = vector.broadcast %c16_i32_20 : i32 to vector<8x128xi32>
    %59 = arith.shrui %57, %58 : vector<8x128xi32>
    %60 = arith.xori %57, %59 : vector<8x128xi32>
    %c2146121005_i32_21 = arith.constant 2146121005 : i32
    %61 = vector.broadcast %c2146121005_i32_21 : i32 to vector<8x128xi32>
    %62 = arith.muli %60, %61 : vector<8x128xi32>
    %c15_i32_22 = arith.constant 15 : i32
    %63 = vector.broadcast %c15_i32_22 : i32 to vector<8x128xi32>
    %64 = arith.shrui %62, %63 : vector<8x128xi32>
    %65 = arith.xori %62, %64 : vector<8x128xi32>
    %c-2073254261_i32_23 = arith.constant -2073254261 : i32
    %66 = vector.broadcast %c-2073254261_i32_23 : i32 to vector<8x128xi32>
    %67 = arith.muli %65, %66 : vector<8x128xi32>
    %c16_i32_24 = arith.constant 16 : i32
    %68 = vector.broadcast %c16_i32_24 : i32 to vector<8x128xi32>
    %69 = arith.shrui %67, %68 : vector<8x128xi32>
    %70 = arith.xori %67, %69 : vector<8x128xi32>
    %c9_i32_25 = arith.constant 9 : i32
    %71 = vector.broadcast %c9_i32_25 : i32 to vector<8x128xi32>
    %72 = arith.shrui %70, %71 : vector<8x128xi32>
    %c1065353216_i32_26 = arith.constant 1065353216 : i32
    %73 = vector.broadcast %c1065353216_i32_26 : i32 to vector<8x128xi32>
    %74 = arith.ori %72, %73 : vector<8x128xi32>
    %75 = tpu.bitcast %74 : vector<8x128xi32> -> vector<8x128xf32>
    %cst_27 = arith.constant 1.000000e+00 : f32
    %76 = vector.broadcast %cst_27 : f32 to vector<8x128xf32>
    %77 = arith.subf %75, %76 : vector<8x128xf32>
    %c0_28 = arith.constant 0 : index
    %c1_29 = arith.constant 1 : index
    %c0_30 = arith.constant 0 : index
    %c0_31 = arith.constant 0 : index
    %78 = vector.load %arg5[%c0_28, %c1_29, %c0_30, %c0_31] : memref<1x12x8x128xf32, #tpu.memory_space<vmem>>, vector<1x1x8x128xf32>
    %79 = vector.shape_cast %78 : vector<1x1x8x128xf32> to vector<8x128xf32>
    %80 = vector.shape_cast %77 : vector<8x128xf32> to vector<1x1x8x128xf32>
    tpu.vector_store %arg5[%c0_28, %c1_29, %c0_30, %c0_31], %80 {strides = array<i32>} : memref<1x12x8x128xf32, #tpu.memory_space<vmem>>, vector<1x1x8x128xf32>,
    %cst_32 = arith.constant 0.230769232 : f32
    %81 = vector.broadcast %cst_32 : f32 to vector<8x128xf32>
    %82 = arith.mulf %9, %81 : vector<8x128xf32>
    %83 = arith.addf %6, %82 : vector<8x128xf32>
    %c0_33 = arith.constant 0 : index
    %c2 = arith.constant 2 : index
    %c0_34 = arith.constant 0 : index
    %c0_35 = arith.constant 0 : index
    %84 = vector.load %arg6[%c0_33, %c2, %c0_34, %c0_35] : memref<1x12x8x128xf32, #tpu.memory_space<vmem>>, vector<1x1x8x128xf32>
    %85 = vector.shape_cast %84 : vector<1x1x8x128xf32> to vector<8x128xf32>
    %86 = vector.shape_cast %83 : vector<8x128xf32> to vector<1x1x8x128xf32>
    tpu.vector_store %arg6[%c0_33, %c2, %c0_34, %c0_35], %86 {strides = array<i32>} : memref<1x12x8x128xf32, #tpu.memory_space<vmem>>, vector<1x1x8x128xf32>,
    %c2048_i32 = arith.constant 2048 : i32
    %87 = arith.addi %4, %c2048_i32 : i32
    %88 = vector.broadcast %87 : i32 to vector<8x128xi32>
    %89 = arith.addi %14, %88 : vector<8x128xi32>
    %90 = tpu.bitcast %89 : vector<8x128xi32> -> vector<8x128xi32>
    %c16_i32_36 = arith.constant 16 : i32
    %91 = vector.broadcast %c16_i32_36 : i32 to vector<8x128xi32>
    %92 = arith.shrui %90, %91 : vector<8x128xi32>
    %93 = arith.xori %90, %92 : vector<8x128xi32>
    %c2146121005_i32_37 = arith.constant 2146121005 : i32
    %94 = vector.broadcast %c2146121005_i32_37 : i32 to vector<8x128xi32>
    %95 = arith.muli %93, %94 : vector<8x128xi32>
    %c15_i32_38 = arith.constant 15 : i32
    %96 = vector.broadcast %c15_i32_38 : i32 to vector<8x128xi32>
    %97 = arith.shrui %95, %96 : vector<8x128xi32>
    %98 = arith.xori %95, %97 : vector<8x128xi32>
    %c-2073254261_i32_39 = arith.constant -2073254261 : i32
    %99 = vector.broadcast %c-2073254261_i32_39 : i32 to vector<8x128xi32>
    %100 = arith.muli %98, %99 : vector<8x128xi32>
    %c16_i32_40 = arith.constant 16 : i32
    %101 = vector.broadcast %c16_i32_40 : i32 to vector<8x128xi32>
    %102 = arith.shrui %100, %101 : vector<8x128xi32>
    %103 = arith.xori %100, %102 : vector<8x128xi32>
    %c9_i32_41 = arith.constant 9 : i32
    %104 = vector.broadcast %c9_i32_41 : i32 to vector<8x128xi32>
    %105 = arith.shrui %103, %104 : vector<8x128xi32>
    %c1065353216_i32_42 = arith.constant 1065353216 : i32
    %106 = vector.broadcast %c1065353216_i32_42 : i32 to vector<8x128xi32>
    %107 = arith.ori %105, %106 : vector<8x128xi32>
    %108 = tpu.bitcast %107 : vector<8x128xi32> -> vector<8x128xf32>
    %cst_43 = arith.constant 1.000000e+00 : f32
    %109 = vector.broadcast %cst_43 : f32 to vector<8x128xf32>
    %110 = arith.subf %108, %109 : vector<8x128xf32>
    %c0_44 = arith.constant 0 : index
    %c2_45 = arith.constant 2 : index
    %c0_46 = arith.constant 0 : index
    %c0_47 = arith.constant 0 : index
    %111 = vector.load %arg5[%c0_44, %c2_45, %c0_46, %c0_47] : memref<1x12x8x128xf32, #tpu.memory_space<vmem>>, vector<1x1x8x128xf32>
    %112 = vector.shape_cast %111 : vector<1x1x8x128xf32> to vector<8x128xf32>
    %113 = vector.shape_cast %110 : vector<8x128xf32> to vector<1x1x8x128xf32>
    tpu.vector_store %arg5[%c0_44, %c2_45, %c0_46, %c0_47], %113 {strides = array<i32>} : memref<1x12x8x128xf32, #tpu.memory_space<vmem>>, vector<1x1x8x128xf32>,
    %cst_48 = arith.constant 0.307692319 : f32
    %114 = vector.broadcast %cst_48 : f32 to vector<8x128xf32>
    %115 = arith.mulf %9, %114 : vector<8x128xf32>
    %116 = arith.addf %6, %115 : vector<8x128xf32>
    %c0_49 = arith.constant 0 : index
    %c3 = arith.constant 3 : index
    %c0_50 = arith.constant 0 : index
    %c0_51 = arith.constant 0 : index
    %117 = vector.load %arg6[%c0_49, %c3, %c0_50, %c0_51] : memref<1x12x8x128xf32, #tpu.memory_space<vmem>>, vector<1x1x8x128xf32>
    %118 = vector.shape_cast %117 : vector<1x1x8x128xf32> to vector<8x128xf32>
    %119 = vector.shape_cast %116 : vector<8x128xf32> to vector<1x1x8x128xf32>
    tpu.vector_store %arg6[%c0_49, %c3, %c0_50, %c0_51], %119 {strides = array<i32>} : memref<1x12x8x128xf32, #tpu.memory_space<vmem>>, vector<1x1x8x128xf32>,
    %c3072_i32 = arith.constant 3072 : i32
    %120 = arith.addi %4, %c3072_i32 : i32
    %121 = vector.broadcast %120 : i32 to vector<8x128xi32>
    %122 = arith.addi %14, %121 : vector<8x128xi32>
    %123 = tpu.bitcast %122 : vector<8x128xi32> -> vector<8x128xi32>
    %c16_i32_52 = arith.constant 16 : i32
    %124 = vector.broadcast %c16_i32_52 : i32 to vector<8x128xi32>
    %125 = arith.shrui %123, %124 : vector<8x128xi32>
    %126 = arith.xori %123, %125 : vector<8x128xi32>
    %c2146121005_i32_53 = arith.constant 2146121005 : i32
    %127 = vector.broadcast %c2146121005_i32_53 : i32 to vector<8x128xi32>
    %128 = arith.muli %126, %127 : vector<8x128xi32>
    %c15_i32_54 = arith.constant 15 : i32
    %129 = vector.broadcast %c15_i32_54 : i32 to vector<8x128xi32>
    %130 = arith.shrui %128, %129 : vector<8x128xi32>
    %131 = arith.xori %128, %130 : vector<8x128xi32>
    %c-2073254261_i32_55 = arith.constant -2073254261 : i32
    %132 = vector.broadcast %c-2073254261_i32_55 : i32 to vector<8x128xi32>
    %133 = arith.muli %131, %132 : vector<8x128xi32>
    %c16_i32_56 = arith.constant 16 : i32
    %134 = vector.broadcast %c16_i32_56 : i32 to vector<8x128xi32>
    %135 = arith.shrui %133, %134 : vector<8x128xi32>
    %136 = arith.xori %133, %135 : vector<8x128xi32>
    %c9_i32_57 = arith.constant 9 : i32
    %137 = vector.broadcast %c9_i32_57 : i32 to vector<8x128xi32>
    %138 = arith.shrui %136, %137 : vector<8x128xi32>
    %c1065353216_i32_58 = arith.constant 1065353216 : i32
    %139 = vector.broadcast %c1065353216_i32_58 : i32 to vector<8x128xi32>
    %140 = arith.ori %138, %139 : vector<8x128xi32>
    %141 = tpu.bitcast %140 : vector<8x128xi32> -> vector<8x128xf32>
    %cst_59 = arith.constant 1.000000e+00 : f32
    %142 = vector.broadcast %cst_59 : f32 to vector<8x128xf32>
    %143 = arith.subf %141, %142 : vector<8x128xf32>
    %c0_60 = arith.constant 0 : index
    %c3_61 = arith.constant 3 : index
    %c0_62 = arith.constant 0 : index
    %c0_63 = arith.constant 0 : index
    %144 = vector.load %arg5[%c0_60, %c3_61, %c0_62, %c0_63] : memref<1x12x8x128xf32, #tpu.memory_space<vmem>>, vector<1x1x8x128xf32>
    %145 = vector.shape_cast %144 : vector<1x1x8x128xf32> to vector<8x128xf32>
    %146 = vector.shape_cast %143 : vector<8x128xf32> to vector<1x1x8x128xf32>
    tpu.vector_store %arg5[%c0_60, %c3_61, %c0_62, %c0_63], %146 {strides = array<i32>} : memref<1x12x8x128xf32, #tpu.memory_space<vmem>>, vector<1x1x8x128xf32>,
    %cst_64 = arith.constant 0.384615391 : f32
    %147 = vector.broadcast %cst_64 : f32 to vector<8x128xf32>
    %148 = arith.mulf %9, %147 : vector<8x128xf32>
    %149 = arith.addf %6, %148 : vector<8x128xf32>
    %c0_65 = arith.constant 0 : index
    %c4 = arith.constant 4 : index
    %c0_66 = arith.constant 0 : index
    %c0_67 = arith.constant 0 : index
    %150 = vector.load %arg6[%c0_65, %c4, %c0_66, %c0_67] : memref<1x12x8x128xf32, #tpu.memory_space<vmem>>, vector<1x1x8x128xf32>
    %151 = vector.shape_cast %150 : vector<1x1x8x128xf32> to vector<8x128xf32>
    %152 = vector.shape_cast %149 : vector<8x128xf32> to vector<1x1x8x128xf32>
    tpu.vector_store %arg6[%c0_65, %c4, %c0_66, %c0_67], %152 {strides = array<i32>} : memref<1x12x8x128xf32, #tpu.memory_space<vmem>>, vector<1x1x8x128xf32>,
    %c4096_i32 = arith.constant 4096 : i32
    %153 = arith.addi %4, %c4096_i32 : i32
    %154 = vector.broadcast %153 : i32 to vector<8x128xi32>
    %155 = arith.addi %14, %154 : vector<8x128xi32>
    %156 = tpu.bitcast %155 : vector<8x128xi32> -> vector<8x128xi32>
    %c16_i32_68 = arith.constant 16 : i32
    %157 = vector.broadcast %c16_i32_68 : i32 to vector<8x128xi32>
    %158 = arith.shrui %156, %157 : vector<8x128xi32>
    %159 = arith.xori %156, %158 : vector<8x128xi32>
    %c2146121005_i32_69 = arith.constant 2146121005 : i32
    %160 = vector.broadcast %c2146121005_i32_69 : i32 to vector<8x128xi32>
    %161 = arith.muli %159, %160 : vector<8x128xi32>
    %c15_i32_70 = arith.constant 15 : i32
    %162 = vector.broadcast %c15_i32_70 : i32 to vector<8x128xi32>
    %163 = arith.shrui %161, %162 : vector<8x128xi32>
    %164 = arith.xori %161, %163 : vector<8x128xi32>
    %c-2073254261_i32_71 = arith.constant -2073254261 : i32
    %165 = vector.broadcast %c-2073254261_i32_71 : i32 to vector<8x128xi32>
    %166 = arith.muli %164, %165 : vector<8x128xi32>
    %c16_i32_72 = arith.constant 16 : i32
    %167 = vector.broadcast %c16_i32_72 : i32 to vector<8x128xi32>
    %168 = arith.shrui %166, %167 : vector<8x128xi32>
    %169 = arith.xori %166, %168 : vector<8x128xi32>
    %c9_i32_73 = arith.constant 9 : i32
    %170 = vector.broadcast %c9_i32_73 : i32 to vector<8x128xi32>
    %171 = arith.shrui %169, %170 : vector<8x128xi32>
    %c1065353216_i32_74 = arith.constant 1065353216 : i32
    %172 = vector.broadcast %c1065353216_i32_74 : i32 to vector<8x128xi32>
    %173 = arith.ori %171, %172 : vector<8x128xi32>
    %174 = tpu.bitcast %173 : vector<8x128xi32> -> vector<8x128xf32>
    %cst_75 = arith.constant 1.000000e+00 : f32
    %175 = vector.broadcast %cst_75 : f32 to vector<8x128xf32>
    %176 = arith.subf %174, %175 : vector<8x128xf32>
    %c0_76 = arith.constant 0 : index
    %c4_77 = arith.constant 4 : index
    %c0_78 = arith.constant 0 : index
    %c0_79 = arith.constant 0 : index
    %177 = vector.load %arg5[%c0_76, %c4_77, %c0_78, %c0_79] : memref<1x12x8x128xf32, #tpu.memory_space<vmem>>, vector<1x1x8x128xf32>
    %178 = vector.shape_cast %177 : vector<1x1x8x128xf32> to vector<8x128xf32>
    %179 = vector.shape_cast %176 : vector<8x128xf32> to vector<1x1x8x128xf32>
    tpu.vector_store %arg5[%c0_76, %c4_77, %c0_78, %c0_79], %179 {strides = array<i32>} : memref<1x12x8x128xf32, #tpu.memory_space<vmem>>, vector<1x1x8x128xf32>,
    %cst_80 = arith.constant 0.461538464 : f32
    %180 = vector.broadcast %cst_80 : f32 to vector<8x128xf32>
    %181 = arith.mulf %9, %180 : vector<8x128xf32>
    %182 = arith.addf %6, %181 : vector<8x128xf32>
    %c0_81 = arith.constant 0 : index
    %c5 = arith.constant 5 : index
    %c0_82 = arith.constant 0 : index
    %c0_83 = arith.constant 0 : index
    %183 = vector.load %arg6[%c0_81, %c5, %c0_82, %c0_83] : memref<1x12x8x128xf32, #tpu.memory_space<vmem>>, vector<1x1x8x128xf32>
    %184 = vector.shape_cast %183 : vector<1x1x8x128xf32> to vector<8x128xf32>
    %185 = vector.shape_cast %182 : vector<8x128xf32> to vector<1x1x8x128xf32>
    tpu.vector_store %arg6[%c0_81, %c5, %c0_82, %c0_83], %185 {strides = array<i32>} : memref<1x12x8x128xf32, #tpu.memory_space<vmem>>, vector<1x1x8x128xf32>,
    %c5120_i32 = arith.constant 5120 : i32
    %186 = arith.addi %4, %c5120_i32 : i32
    %187 = vector.broadcast %186 : i32 to vector<8x128xi32>
    %188 = arith.addi %14, %187 : vector<8x128xi32>
    %189 = tpu.bitcast %188 : vector<8x128xi32> -> vector<8x128xi32>
    %c16_i32_84 = arith.constant 16 : i32
    %190 = vector.broadcast %c16_i32_84 : i32 to vector<8x128xi32>
    %191 = arith.shrui %189, %190 : vector<8x128xi32>
    %192 = arith.xori %189, %191 : vector<8x128xi32>
    %c2146121005_i32_85 = arith.constant 2146121005 : i32
    %193 = vector.broadcast %c2146121005_i32_85 : i32 to vector<8x128xi32>
    %194 = arith.muli %192, %193 : vector<8x128xi32>
    %c15_i32_86 = arith.constant 15 : i32
    %195 = vector.broadcast %c15_i32_86 : i32 to vector<8x128xi32>
    %196 = arith.shrui %194, %195 : vector<8x128xi32>
    %197 = arith.xori %194, %196 : vector<8x128xi32>
    %c-2073254261_i32_87 = arith.constant -2073254261 : i32
    %198 = vector.broadcast %c-2073254261_i32_87 : i32 to vector<8x128xi32>
    %199 = arith.muli %197, %198 : vector<8x128xi32>
    %c16_i32_88 = arith.constant 16 : i32
    %200 = vector.broadcast %c16_i32_88 : i32 to vector<8x128xi32>
    %201 = arith.shrui %199, %200 : vector<8x128xi32>
    %202 = arith.xori %199, %201 : vector<8x128xi32>
    %c9_i32_89 = arith.constant 9 : i32
    %203 = vector.broadcast %c9_i32_89 : i32 to vector<8x128xi32>
    %204 = arith.shrui %202, %203 : vector<8x128xi32>
    %c1065353216_i32_90 = arith.constant 1065353216 : i32
    %205 = vector.broadcast %c1065353216_i32_90 : i32 to vector<8x128xi32>
    %206 = arith.ori %204, %205 : vector<8x128xi32>
    %207 = tpu.bitcast %206 : vector<8x128xi32> -> vector<8x128xf32>
    %cst_91 = arith.constant 1.000000e+00 : f32
    %208 = vector.broadcast %cst_91 : f32 to vector<8x128xf32>
    %209 = arith.subf %207, %208 : vector<8x128xf32>
    %c0_92 = arith.constant 0 : index
    %c5_93 = arith.constant 5 : index
    %c0_94 = arith.constant 0 : index
    %c0_95 = arith.constant 0 : index
    %210 = vector.load %arg5[%c0_92, %c5_93, %c0_94, %c0_95] : memref<1x12x8x128xf32, #tpu.memory_space<vmem>>, vector<1x1x8x128xf32>
    %211 = vector.shape_cast %210 : vector<1x1x8x128xf32> to vector<8x128xf32>
    %212 = vector.shape_cast %209 : vector<8x128xf32> to vector<1x1x8x128xf32>
    tpu.vector_store %arg5[%c0_92, %c5_93, %c0_94, %c0_95], %212 {strides = array<i32>} : memref<1x12x8x128xf32, #tpu.memory_space<vmem>>, vector<1x1x8x128xf32>,
    %cst_96 = arith.constant 0.538461566 : f32
    %213 = vector.broadcast %cst_96 : f32 to vector<8x128xf32>
    %214 = arith.mulf %9, %213 : vector<8x128xf32>
    %215 = arith.addf %6, %214 : vector<8x128xf32>
    %c0_97 = arith.constant 0 : index
    %c6 = arith.constant 6 : index
    %c0_98 = arith.constant 0 : index
    %c0_99 = arith.constant 0 : index
    %216 = vector.load %arg6[%c0_97, %c6, %c0_98, %c0_99] : memref<1x12x8x128xf32, #tpu.memory_space<vmem>>, vector<1x1x8x128xf32>
    %217 = vector.shape_cast %216 : vector<1x1x8x128xf32> to vector<8x128xf32>
    %218 = vector.shape_cast %215 : vector<8x128xf32> to vector<1x1x8x128xf32>
    tpu.vector_store %arg6[%c0_97, %c6, %c0_98, %c0_99], %218 {strides = array<i32>} : memref<1x12x8x128xf32, #tpu.memory_space<vmem>>, vector<1x1x8x128xf32>,
    %c6144_i32 = arith.constant 6144 : i32
    %219 = arith.addi %4, %c6144_i32 : i32
    %220 = vector.broadcast %219 : i32 to vector<8x128xi32>
    %221 = arith.addi %14, %220 : vector<8x128xi32>
    %222 = tpu.bitcast %221 : vector<8x128xi32> -> vector<8x128xi32>
    %c16_i32_100 = arith.constant 16 : i32
    %223 = vector.broadcast %c16_i32_100 : i32 to vector<8x128xi32>
    %224 = arith.shrui %222, %223 : vector<8x128xi32>
    %225 = arith.xori %222, %224 : vector<8x128xi32>
    %c2146121005_i32_101 = arith.constant 2146121005 : i32
    %226 = vector.broadcast %c2146121005_i32_101 : i32 to vector<8x128xi32>
    %227 = arith.muli %225, %226 : vector<8x128xi32>
    %c15_i32_102 = arith.constant 15 : i32
    %228 = vector.broadcast %c15_i32_102 : i32 to vector<8x128xi32>
    %229 = arith.shrui %227, %228 : vector<8x128xi32>
    %230 = arith.xori %227, %229 : vector<8x128xi32>
    %c-2073254261_i32_103 = arith.constant -2073254261 : i32
    %231 = vector.broadcast %c-2073254261_i32_103 : i32 to vector<8x128xi32>
    %232 = arith.muli %230, %231 : vector<8x128xi32>
    %c16_i32_104 = arith.constant 16 : i32
    %233 = vector.broadcast %c16_i32_104 : i32 to vector<8x128xi32>
    %234 = arith.shrui %232, %233 : vector<8x128xi32>
    %235 = arith.xori %232, %234 : vector<8x128xi32>
    %c9_i32_105 = arith.constant 9 : i32
    %236 = vector.broadcast %c9_i32_105 : i32 to vector<8x128xi32>
    %237 = arith.shrui %235, %236 : vector<8x128xi32>
    %c1065353216_i32_106 = arith.constant 1065353216 : i32
    %238 = vector.broadcast %c1065353216_i32_106 : i32 to vector<8x128xi32>
    %239 = arith.ori %237, %238 : vector<8x128xi32>
    %240 = tpu.bitcast %239 : vector<8x128xi32> -> vector<8x128xf32>
    %cst_107 = arith.constant 1.000000e+00 : f32
    %241 = vector.broadcast %cst_107 : f32 to vector<8x128xf32>
    %242 = arith.subf %240, %241 : vector<8x128xf32>
    %c0_108 = arith.constant 0 : index
    %c6_109 = arith.constant 6 : index
    %c0_110 = arith.constant 0 : index
    %c0_111 = arith.constant 0 : index
    %243 = vector.load %arg5[%c0_108, %c6_109, %c0_110, %c0_111] : memref<1x12x8x128xf32, #tpu.memory_space<vmem>>, vector<1x1x8x128xf32>
    %244 = vector.shape_cast %243 : vector<1x1x8x128xf32> to vector<8x128xf32>
    %245 = vector.shape_cast %242 : vector<8x128xf32> to vector<1x1x8x128xf32>
    tpu.vector_store %arg5[%c0_108, %c6_109, %c0_110, %c0_111], %245 {strides = array<i32>} : memref<1x12x8x128xf32, #tpu.memory_space<vmem>>, vector<1x1x8x128xf32>,
    %cst_112 = arith.constant 0.615384638 : f32
    %246 = vector.broadcast %cst_112 : f32 to vector<8x128xf32>
    %247 = arith.mulf %9, %246 : vector<8x128xf32>
    %248 = arith.addf %6, %247 : vector<8x128xf32>
    %c0_113 = arith.constant 0 : index
    %c7 = arith.constant 7 : index
    %c0_114 = arith.constant 0 : index
    %c0_115 = arith.constant 0 : index
    %249 = vector.load %arg6[%c0_113, %c7, %c0_114, %c0_115] : memref<1x12x8x128xf32, #tpu.memory_space<vmem>>, vector<1x1x8x128xf32>
    %250 = vector.shape_cast %249 : vector<1x1x8x128xf32> to vector<8x128xf32>
    %251 = vector.shape_cast %248 : vector<8x128xf32> to vector<1x1x8x128xf32>
    tpu.vector_store %arg6[%c0_113, %c7, %c0_114, %c0_115], %251 {strides = array<i32>} : memref<1x12x8x128xf32, #tpu.memory_space<vmem>>, vector<1x1x8x128xf32>,
    %c7168_i32 = arith.constant 7168 : i32
    %252 = arith.addi %4, %c7168_i32 : i32
    %253 = vector.broadcast %252 : i32 to vector<8x128xi32>
    %254 = arith.addi %14, %253 : vector<8x128xi32>
    %255 = tpu.bitcast %254 : vector<8x128xi32> -> vector<8x128xi32>
    %c16_i32_116 = arith.constant 16 : i32
    %256 = vector.broadcast %c16_i32_116 : i32 to vector<8x128xi32>
    %257 = arith.shrui %255, %256 : vector<8x128xi32>
    %258 = arith.xori %255, %257 : vector<8x128xi32>
    %c2146121005_i32_117 = arith.constant 2146121005 : i32
    %259 = vector.broadcast %c2146121005_i32_117 : i32 to vector<8x128xi32>
    %260 = arith.muli %258, %259 : vector<8x128xi32>
    %c15_i32_118 = arith.constant 15 : i32
    %261 = vector.broadcast %c15_i32_118 : i32 to vector<8x128xi32>
    %262 = arith.shrui %260, %261 : vector<8x128xi32>
    %263 = arith.xori %260, %262 : vector<8x128xi32>
    %c-2073254261_i32_119 = arith.constant -2073254261 : i32
    %264 = vector.broadcast %c-2073254261_i32_119 : i32 to vector<8x128xi32>
    %265 = arith.muli %263, %264 : vector<8x128xi32>
    %c16_i32_120 = arith.constant 16 : i32
    %266 = vector.broadcast %c16_i32_120 : i32 to vector<8x128xi32>
    %267 = arith.shrui %265, %266 : vector<8x128xi32>
    %268 = arith.xori %265, %267 : vector<8x128xi32>
    %c9_i32_121 = arith.constant 9 : i32
    %269 = vector.broadcast %c9_i32_121 : i32 to vector<8x128xi32>
    %270 = arith.shrui %268, %269 : vector<8x128xi32>
    %c1065353216_i32_122 = arith.constant 1065353216 : i32
    %271 = vector.broadcast %c1065353216_i32_122 : i32 to vector<8x128xi32>
    %272 = arith.ori %270, %271 : vector<8x128xi32>
    %273 = tpu.bitcast %272 : vector<8x128xi32> -> vector<8x128xf32>
    %cst_123 = arith.constant 1.000000e+00 : f32
    %274 = vector.broadcast %cst_123 : f32 to vector<8x128xf32>
    %275 = arith.subf %273, %274 : vector<8x128xf32>
    %c0_124 = arith.constant 0 : index
    %c7_125 = arith.constant 7 : index
    %c0_126 = arith.constant 0 : index
    %c0_127 = arith.constant 0 : index
    %276 = vector.load %arg5[%c0_124, %c7_125, %c0_126, %c0_127] : memref<1x12x8x128xf32, #tpu.memory_space<vmem>>, vector<1x1x8x128xf32>
    %277 = vector.shape_cast %276 : vector<1x1x8x128xf32> to vector<8x128xf32>
    %278 = vector.shape_cast %275 : vector<8x128xf32> to vector<1x1x8x128xf32>
    tpu.vector_store %arg5[%c0_124, %c7_125, %c0_126, %c0_127], %278 {strides = array<i32>} : memref<1x12x8x128xf32, #tpu.memory_space<vmem>>, vector<1x1x8x128xf32>,
    %cst_128 = arith.constant 0.692307711 : f32
    %279 = vector.broadcast %cst_128 : f32 to vector<8x128xf32>
    %280 = arith.mulf %9, %279 : vector<8x128xf32>
    %281 = arith.addf %6, %280 : vector<8x128xf32>
    %c0_129 = arith.constant 0 : index
    %c8 = arith.constant 8 : index
    %c0_130 = arith.constant 0 : index
    %c0_131 = arith.constant 0 : index
    %282 = vector.load %arg6[%c0_129, %c8, %c0_130, %c0_131] : memref<1x12x8x128xf32, #tpu.memory_space<vmem>>, vector<1x1x8x128xf32>
    %283 = vector.shape_cast %282 : vector<1x1x8x128xf32> to vector<8x128xf32>
    %284 = vector.shape_cast %281 : vector<8x128xf32> to vector<1x1x8x128xf32>
    tpu.vector_store %arg6[%c0_129, %c8, %c0_130, %c0_131], %284 {strides = array<i32>} : memref<1x12x8x128xf32, #tpu.memory_space<vmem>>, vector<1x1x8x128xf32>,
    %c8192_i32 = arith.constant 8192 : i32
    %285 = arith.addi %4, %c8192_i32 : i32
    %286 = vector.broadcast %285 : i32 to vector<8x128xi32>
    %287 = arith.addi %14, %286 : vector<8x128xi32>
    %288 = tpu.bitcast %287 : vector<8x128xi32> -> vector<8x128xi32>
    %c16_i32_132 = arith.constant 16 : i32
    %289 = vector.broadcast %c16_i32_132 : i32 to vector<8x128xi32>
    %290 = arith.shrui %288, %289 : vector<8x128xi32>
    %291 = arith.xori %288, %290 : vector<8x128xi32>
    %c2146121005_i32_133 = arith.constant 2146121005 : i32
    %292 = vector.broadcast %c2146121005_i32_133 : i32 to vector<8x128xi32>
    %293 = arith.muli %291, %292 : vector<8x128xi32>
    %c15_i32_134 = arith.constant 15 : i32
    %294 = vector.broadcast %c15_i32_134 : i32 to vector<8x128xi32>
    %295 = arith.shrui %293, %294 : vector<8x128xi32>
    %296 = arith.xori %293, %295 : vector<8x128xi32>
    %c-2073254261_i32_135 = arith.constant -2073254261 : i32
    %297 = vector.broadcast %c-2073254261_i32_135 : i32 to vector<8x128xi32>
    %298 = arith.muli %296, %297 : vector<8x128xi32>
    %c16_i32_136 = arith.constant 16 : i32
    %299 = vector.broadcast %c16_i32_136 : i32 to vector<8x128xi32>
    %300 = arith.shrui %298, %299 : vector<8x128xi32>
    %301 = arith.xori %298, %300 : vector<8x128xi32>
    %c9_i32_137 = arith.constant 9 : i32
    %302 = vector.broadcast %c9_i32_137 : i32 to vector<8x128xi32>
    %303 = arith.shrui %301, %302 : vector<8x128xi32>
    %c1065353216_i32_138 = arith.constant 1065353216 : i32
    %304 = vector.broadcast %c1065353216_i32_138 : i32 to vector<8x128xi32>
    %305 = arith.ori %303, %304 : vector<8x128xi32>
    %306 = tpu.bitcast %305 : vector<8x128xi32> -> vector<8x128xf32>
    %cst_139 = arith.constant 1.000000e+00 : f32
    %307 = vector.broadcast %cst_139 : f32 to vector<8x128xf32>
    %308 = arith.subf %306, %307 : vector<8x128xf32>
    %c0_140 = arith.constant 0 : index
    %c8_141 = arith.constant 8 : index
    %c0_142 = arith.constant 0 : index
    %c0_143 = arith.constant 0 : index
    %309 = vector.load %arg5[%c0_140, %c8_141, %c0_142, %c0_143] : memref<1x12x8x128xf32, #tpu.memory_space<vmem>>, vector<1x1x8x128xf32>
    %310 = vector.shape_cast %309 : vector<1x1x8x128xf32> to vector<8x128xf32>
    %311 = vector.shape_cast %308 : vector<8x128xf32> to vector<1x1x8x128xf32>
    tpu.vector_store %arg5[%c0_140, %c8_141, %c0_142, %c0_143], %311 {strides = array<i32>} : memref<1x12x8x128xf32, #tpu.memory_space<vmem>>, vector<1x1x8x128xf32>,
    %cst_144 = arith.constant 0.769230782 : f32
    %312 = vector.broadcast %cst_144 : f32 to vector<8x128xf32>
    %313 = arith.mulf %9, %312 : vector<8x128xf32>
    %314 = arith.addf %6, %313 : vector<8x128xf32>
    %c0_145 = arith.constant 0 : index
    %c9 = arith.constant 9 : index
    %c0_146 = arith.constant 0 : index
    %c0_147 = arith.constant 0 : index
    %315 = vector.load %arg6[%c0_145, %c9, %c0_146, %c0_147] : memref<1x12x8x128xf32, #tpu.memory_space<vmem>>, vector<1x1x8x128xf32>
    %316 = vector.shape_cast %315 : vector<1x1x8x128xf32> to vector<8x128xf32>
    %317 = vector.shape_cast %314 : vector<8x128xf32> to vector<1x1x8x128xf32>
    tpu.vector_store %arg6[%c0_145, %c9, %c0_146, %c0_147], %317 {strides = array<i32>} : memref<1x12x8x128xf32, #tpu.memory_space<vmem>>, vector<1x1x8x128xf32>,
    %c9216_i32 = arith.constant 9216 : i32
    %318 = arith.addi %4, %c9216_i32 : i32
    %319 = vector.broadcast %318 : i32 to vector<8x128xi32>
    %320 = arith.addi %14, %319 : vector<8x128xi32>
    %321 = tpu.bitcast %320 : vector<8x128xi32> -> vector<8x128xi32>
    %c16_i32_148 = arith.constant 16 : i32
    %322 = vector.broadcast %c16_i32_148 : i32 to vector<8x128xi32>
    %323 = arith.shrui %321, %322 : vector<8x128xi32>
    %324 = arith.xori %321, %323 : vector<8x128xi32>
    %c2146121005_i32_149 = arith.constant 2146121005 : i32
    %325 = vector.broadcast %c2146121005_i32_149 : i32 to vector<8x128xi32>
    %326 = arith.muli %324, %325 : vector<8x128xi32>
    %c15_i32_150 = arith.constant 15 : i32
    %327 = vector.broadcast %c15_i32_150 : i32 to vector<8x128xi32>
    %328 = arith.shrui %326, %327 : vector<8x128xi32>
    %329 = arith.xori %326, %328 : vector<8x128xi32>
    %c-2073254261_i32_151 = arith.constant -2073254261 : i32
    %330 = vector.broadcast %c-2073254261_i32_151 : i32 to vector<8x128xi32>
    %331 = arith.muli %329, %330 : vector<8x128xi32>
    %c16_i32_152 = arith.constant 16 : i32
    %332 = vector.broadcast %c16_i32_152 : i32 to vector<8x128xi32>
    %333 = arith.shrui %331, %332 : vector<8x128xi32>
    %334 = arith.xori %331, %333 : vector<8x128xi32>
    %c9_i32_153 = arith.constant 9 : i32
    %335 = vector.broadcast %c9_i32_153 : i32 to vector<8x128xi32>
    %336 = arith.shrui %334, %335 : vector<8x128xi32>
    %c1065353216_i32_154 = arith.constant 1065353216 : i32
    %337 = vector.broadcast %c1065353216_i32_154 : i32 to vector<8x128xi32>
    %338 = arith.ori %336, %337 : vector<8x128xi32>
    %339 = tpu.bitcast %338 : vector<8x128xi32> -> vector<8x128xf32>
    %cst_155 = arith.constant 1.000000e+00 : f32
    %340 = vector.broadcast %cst_155 : f32 to vector<8x128xf32>
    %341 = arith.subf %339, %340 : vector<8x128xf32>
    %c0_156 = arith.constant 0 : index
    %c9_157 = arith.constant 9 : index
    %c0_158 = arith.constant 0 : index
    %c0_159 = arith.constant 0 : index
    %342 = vector.load %arg5[%c0_156, %c9_157, %c0_158, %c0_159] : memref<1x12x8x128xf32, #tpu.memory_space<vmem>>, vector<1x1x8x128xf32>
    %343 = vector.shape_cast %342 : vector<1x1x8x128xf32> to vector<8x128xf32>
    %344 = vector.shape_cast %341 : vector<8x128xf32> to vector<1x1x8x128xf32>
    tpu.vector_store %arg5[%c0_156, %c9_157, %c0_158, %c0_159], %344 {strides = array<i32>} : memref<1x12x8x128xf32, #tpu.memory_space<vmem>>, vector<1x1x8x128xf32>,
    %cst_160 = arith.constant 0.846153855 : f32
    %345 = vector.broadcast %cst_160 : f32 to vector<8x128xf32>
    %346 = arith.mulf %9, %345 : vector<8x128xf32>
    %347 = arith.addf %6, %346 : vector<8x128xf32>
    %c0_161 = arith.constant 0 : index
    %c10 = arith.constant 10 : index
    %c0_162 = arith.constant 0 : index
    %c0_163 = arith.constant 0 : index
    %348 = vector.load %arg6[%c0_161, %c10, %c0_162, %c0_163] : memref<1x12x8x128xf32, #tpu.memory_space<vmem>>, vector<1x1x8x128xf32>
    %349 = vector.shape_cast %348 : vector<1x1x8x128xf32> to vector<8x128xf32>
    %350 = vector.shape_cast %347 : vector<8x128xf32> to vector<1x1x8x128xf32>
    tpu.vector_store %arg6[%c0_161, %c10, %c0_162, %c0_163], %350 {strides = array<i32>} : memref<1x12x8x128xf32, #tpu.memory_space<vmem>>, vector<1x1x8x128xf32>,
    %c10240_i32 = arith.constant 10240 : i32
    %351 = arith.addi %4, %c10240_i32 : i32
    %352 = vector.broadcast %351 : i32 to vector<8x128xi32>
    %353 = arith.addi %14, %352 : vector<8x128xi32>
    %354 = tpu.bitcast %353 : vector<8x128xi32> -> vector<8x128xi32>
    %c16_i32_164 = arith.constant 16 : i32
    %355 = vector.broadcast %c16_i32_164 : i32 to vector<8x128xi32>
    %356 = arith.shrui %354, %355 : vector<8x128xi32>
    %357 = arith.xori %354, %356 : vector<8x128xi32>
    %c2146121005_i32_165 = arith.constant 2146121005 : i32
    %358 = vector.broadcast %c2146121005_i32_165 : i32 to vector<8x128xi32>
    %359 = arith.muli %357, %358 : vector<8x128xi32>
    %c15_i32_166 = arith.constant 15 : i32
    %360 = vector.broadcast %c15_i32_166 : i32 to vector<8x128xi32>
    %361 = arith.shrui %359, %360 : vector<8x128xi32>
    %362 = arith.xori %359, %361 : vector<8x128xi32>
    %c-2073254261_i32_167 = arith.constant -2073254261 : i32
    %363 = vector.broadcast %c-2073254261_i32_167 : i32 to vector<8x128xi32>
    %364 = arith.muli %362, %363 : vector<8x128xi32>
    %c16_i32_168 = arith.constant 16 : i32
    %365 = vector.broadcast %c16_i32_168 : i32 to vector<8x128xi32>
    %366 = arith.shrui %364, %365 : vector<8x128xi32>
    %367 = arith.xori %364, %366 : vector<8x128xi32>
    %c9_i32_169 = arith.constant 9 : i32
    %368 = vector.broadcast %c9_i32_169 : i32 to vector<8x128xi32>
    %369 = arith.shrui %367, %368 : vector<8x128xi32>
    %c1065353216_i32_170 = arith.constant 1065353216 : i32
    %370 = vector.broadcast %c1065353216_i32_170 : i32 to vector<8x128xi32>
    %371 = arith.ori %369, %370 : vector<8x128xi32>
    %372 = tpu.bitcast %371 : vector<8x128xi32> -> vector<8x128xf32>
    %cst_171 = arith.constant 1.000000e+00 : f32
    %373 = vector.broadcast %cst_171 : f32 to vector<8x128xf32>
    %374 = arith.subf %372, %373 : vector<8x128xf32>
    %c0_172 = arith.constant 0 : index
    %c10_173 = arith.constant 10 : index
    %c0_174 = arith.constant 0 : index
    %c0_175 = arith.constant 0 : index
    %375 = vector.load %arg5[%c0_172, %c10_173, %c0_174, %c0_175] : memref<1x12x8x128xf32, #tpu.memory_space<vmem>>, vector<1x1x8x128xf32>
    %376 = vector.shape_cast %375 : vector<1x1x8x128xf32> to vector<8x128xf32>
    %377 = vector.shape_cast %374 : vector<8x128xf32> to vector<1x1x8x128xf32>
    tpu.vector_store %arg5[%c0_172, %c10_173, %c0_174, %c0_175], %377 {strides = array<i32>} : memref<1x12x8x128xf32, #tpu.memory_space<vmem>>, vector<1x1x8x128xf32>,
    %cst_176 = arith.constant 0.923076927 : f32
    %378 = vector.broadcast %cst_176 : f32 to vector<8x128xf32>
    %379 = arith.mulf %9, %378 : vector<8x128xf32>
    %380 = arith.addf %6, %379 : vector<8x128xf32>
    %c0_177 = arith.constant 0 : index
    %c11 = arith.constant 11 : index
    %c0_178 = arith.constant 0 : index
    %c0_179 = arith.constant 0 : index
    %381 = vector.load %arg6[%c0_177, %c11, %c0_178, %c0_179] : memref<1x12x8x128xf32, #tpu.memory_space<vmem>>, vector<1x1x8x128xf32>
    %382 = vector.shape_cast %381 : vector<1x1x8x128xf32> to vector<8x128xf32>
    %383 = vector.shape_cast %380 : vector<8x128xf32> to vector<1x1x8x128xf32>
    tpu.vector_store %arg6[%c0_177, %c11, %c0_178, %c0_179], %383 {strides = array<i32>} : memref<1x12x8x128xf32, #tpu.memory_space<vmem>>, vector<1x1x8x128xf32>,
    %c11264_i32 = arith.constant 11264 : i32
    %384 = arith.addi %4, %c11264_i32 : i32
    %385 = vector.broadcast %384 : i32 to vector<8x128xi32>
    %386 = arith.addi %14, %385 : vector<8x128xi32>
    %387 = tpu.bitcast %386 : vector<8x128xi32> -> vector<8x128xi32>
    %c16_i32_180 = arith.constant 16 : i32
    %388 = vector.broadcast %c16_i32_180 : i32 to vector<8x128xi32>
    %389 = arith.shrui %387, %388 : vector<8x128xi32>
    %390 = arith.xori %387, %389 : vector<8x128xi32>
    %c2146121005_i32_181 = arith.constant 2146121005 : i32
    %391 = vector.broadcast %c2146121005_i32_181 : i32 to vector<8x128xi32>
    %392 = arith.muli %390, %391 : vector<8x128xi32>
    %c15_i32_182 = arith.constant 15 : i32
    %393 = vector.broadcast %c15_i32_182 : i32 to vector<8x128xi32>
    %394 = arith.shrui %392, %393 : vector<8x128xi32>
    %395 = arith.xori %392, %394 : vector<8x128xi32>
    %c-2073254261_i32_183 = arith.constant -2073254261 : i32
    %396 = vector.broadcast %c-2073254261_i32_183 : i32 to vector<8x128xi32>
    %397 = arith.muli %395, %396 : vector<8x128xi32>
    %c16_i32_184 = arith.constant 16 : i32
    %398 = vector.broadcast %c16_i32_184 : i32 to vector<8x128xi32>
    %399 = arith.shrui %397, %398 : vector<8x128xi32>
    %400 = arith.xori %397, %399 : vector<8x128xi32>
    %c9_i32_185 = arith.constant 9 : i32
    %401 = vector.broadcast %c9_i32_185 : i32 to vector<8x128xi32>
    %402 = arith.shrui %400, %401 : vector<8x128xi32>
    %c1065353216_i32_186 = arith.constant 1065353216 : i32
    %403 = vector.broadcast %c1065353216_i32_186 : i32 to vector<8x128xi32>
    %404 = arith.ori %402, %403 : vector<8x128xi32>
    %405 = tpu.bitcast %404 : vector<8x128xi32> -> vector<8x128xf32>
    %cst_187 = arith.constant 1.000000e+00 : f32
    %406 = vector.broadcast %cst_187 : f32 to vector<8x128xf32>
    %407 = arith.subf %405, %406 : vector<8x128xf32>
    %c0_188 = arith.constant 0 : index
    %c11_189 = arith.constant 11 : index
    %c0_190 = arith.constant 0 : index
    %c0_191 = arith.constant 0 : index
    %408 = vector.load %arg5[%c0_188, %c11_189, %c0_190, %c0_191] : memref<1x12x8x128xf32, #tpu.memory_space<vmem>>, vector<1x1x8x128xf32>
    %409 = vector.shape_cast %408 : vector<1x1x8x128xf32> to vector<8x128xf32>
    %410 = vector.shape_cast %407 : vector<8x128xf32> to vector<1x1x8x128xf32>
    tpu.vector_store %arg5[%c0_188, %c11_189, %c0_190, %c0_191], %410 {strides = array<i32>} : memref<1x12x8x128xf32, #tpu.memory_space<vmem>>, vector<1x1x8x128xf32>,
    return
  }
  func.func @transform_0(%arg0: i32, %arg1: i32, %arg2: memref<1xi32, #tpu.memory_space<smem>>) -> (i32, i32, i32) {
    %c0_i32 = arith.constant 0 : i32
    %c0_i32_0 = arith.constant 0 : i32
    return %arg0, %arg1, %c0_i32 : i32, i32, i32
  }
  func.func @transform_1(%arg0: i32, %arg1: i32, %arg2: memref<1xi32, #tpu.memory_space<smem>>) -> (i32, i32, i32) {
    %c0_i32 = arith.constant 0 : i32
    %c0_i32_0 = arith.constant 0 : i32
    return %arg0, %arg1, %c0_i32 : i32, i32, i32
  }
  func.func @transform_2(%arg0: i32, %arg1: i32, %arg2: memref<1xi32, #tpu.memory_space<smem>>) -> (i32, i32, i32, i32) {
    %c0_i32 = arith.constant 0 : i32
    %c0_i32_0 = arith.constant 0 : i32
    %c0_i32_1 = arith.constant 0 : i32
    return %arg0, %c0_i32, %arg1, %c0_i32_0 : i32, i32, i32, i32
  }
  func.func @transform_3(%arg0: i32, %arg1: i32, %arg2: memref<1xi32, #tpu.memory_space<smem>>) -> (i32, i32, i32, i32) {
    %c0_i32 = arith.constant 0 : i32
    %c0_i32_0 = arith.constant 0 : i32
    %c0_i32_1 = arith.constant 0 : i32
    return %arg0, %c0_i32, %arg1, %c0_i32_0 : i32, i32, i32, i32
  }
}

</mosaic_0001>

<bundles_post_ra>
// kernel: disparity_initialization.1
= control target key start
LH: loop header
LB: loop body
LE: loop exit
PB: predicated region body
PF: predicated region fallthrough
CT: control target
= control target key end

     0   :  { %s776_s17 = smov 0   ;;  %s778_s18 = smov 0   ;;  %s908_s0 = inlined_call_operand.<no memory space> [shape: s32[1], index: 0, kind: input, shape index: {}]   ;;  %s909_s1 = inlined_call_operand.vmem [shape: f32[2,8,128], index: 1, kind: input, shape index: {}]   ;;  %s910_s2 = inlined_call_operand.vmem [shape: f32[2,8,128], index: 2, kind: input, shape index: {}]   ;;  %s911_s3 = inlined_call_operand.vmem [shape: f32[2,12,8,128], index: 3, kind: output, shape index: {0}]   ;;  %s912_s4 = inlined_call_operand.vmem [shape: f32[2,12,8,128], index: 4, kind: output, shape index: {1}]  }
   0x1   :  { %10 = sst [smem:[#allocation3]] %s908_s0  ;;  %s780_s19 = smov 0  }
   0x2 LB: > { %s28_s0 = sadd.s32 1, %s742_s18  ;;  %p658_p0 = scmp.ge.s32.totalorder %s746_s19, 1  ;;  %s746_s19 = sphi %s780_s19, %s16_s19   ;;  %s742_s18 = sphi %s778_s18, %s914_s18   ;;  %s738_s17 = sphi %s776_s17, %s913_s17  }
   0x3   : > { %p30_p1 = scmp.ge.s32.totalorder %s28_s0, 2  ;;  %p176_p2 = scmp.lt.s32.totalorder %s746_s19, 3 }
   0x5   : > { %s916_s0 = smov (%p30_p1, %s28_s0), 0  ;;  %p177_p3 = pnand %p658_p0, %p176_p2 }
   0x6   : > { %p220_p4 = scmp.lt.s32.totalorder (!%p177_p3), %s738_s17, 1  ;;  %s251_s20 = sld [smem:[#allocation3]] (!%p177_p3)  ;;  %v257_v0 = vlaneseq (!%p177_p3) }
   0x7   : > { %180 = sbr.rel (%p177_p3) target bundleno = 74 (0x4a), region = 28 }
   0x8   : > { %v258_v1 = vshrl.u32 (!%p177_p3), %v257_v0, 7  ;;  %v260_v2 = vand.u32 (!%p177_p3), 127, %v257_v0  ;;  %s252_s22 = smul.u32 (!%p177_p3), 12288, %s738_s17 }
   0xa   : > { %v261_v3 = vmul.u32 (!%p177_p3), 128, %v258_v1 }
   0xc   : > { %v806_v6 = vadd.s32 (!%p177_p3), %v261_v3, %v260_v2  ;;  %s811_s5 = sadd.s32 (!%p177_p3), %s252_s22, %s251_s20 }
   0xd   : > { %v266_v8 = vstv (!%p177_p3), %s811_s5  ;;  %s285_s6 = sadd.s32 (!%p177_p3), 1024, %s811_s5  ;;  %s306_s7 = sadd.s32 (!%p177_p3), 2048, %s811_s5 }
   0xe   : > { %s794_s21 = scalar_select %p220_p4, %s738_s17, 1  ;;  %v267_v10 = vadd.s32 %v266_v8, %v806_v6  ;;  %v286_v12 = vstv %s285_s6  ;;  %v307_v15 = vstv %s306_s7 }
   0xf   : > { %s327_s8 = sadd.s32 3072, %s811_s5  ;;  %v287_v13 = vadd.s32 %v286_v12, %v806_v6  ;;  %v308_v20 = vadd.s32 %v307_v15, %v806_v6  ;;  %s348_s12 = sadd.s32 4096, %s811_s5 }
  0x10   : > { %s659_s23 = sshll.u32 %s794_s21, 3  ;;  %s699_s30 = smul.u32 96, %s794_s21  ;;  %v268_v18 = vshrl.u32 %v267_v10, 16  ;;  %v328_v24 = vstv %s327_s8  ;;  %v349_v30 = vstv %s348_s12 }
  0x11   : > { %s226_s26 = scalar_lea.vmem %s909_s1, %s659_s23  ;;  %s233_s29 = scalar_lea.vmem %s910_s2, %s659_s23  ;;  %v288_v21 = vshrl.u32 %v287_v13, 16  ;;  %v309_v26 = vshrl.u32 %v308_v20, 16  ;;  %v329_v27 = vadd.s32 %v328_v24, %v806_v6  ;;  %v350_v38 = vadd.s32 %v349_v30, %v806_v6 }
  0x12   : > { %v804_v4 = vld [vmem:[%s226_s26] sm:$0xff]  ;;  %s825_s11 = scalar_lea.vmem %s912_s4, %s699_s30  ;;  %s369_s13 = sadd.s32 5120, %s811_s5  ;;  %v269_v25 = vxor.u32 %v268_v18, %v267_v10 }
  0x13   : > { %v255_v5 = vld [vmem:[%s233_s29] sm:$0xff]  ;;  %v289_v29 = vxor.u32 %v288_v21, %v287_v13  ;;  %v370_v32 = vstv %s369_s13  ;;  %v310_v34 = vxor.u32 %v309_v26, %v308_v20  ;;  %v330_v35 = vshrl.u32 %v329_v27, 16  ;;  %s390_s14 = sadd.s32 6144, %s811_s5  ;;  %s411_s15 = sadd.s32 7168, %s811_s5 }
  0x14   : > { %v809_v7 = vsub.f32 %v255_v5, %v804_v4  ;;  %v270_v33 = vmul.u32 2146121005, %v269_v25  ;;  %v371_v40 = vadd.s32 %v370_v32, %v806_v6  ;;  %v351_v46 = vshrl.u32 %v350_v38, 16  ;;  %s865_s20 = scalar_lea.vmem %s911_s3, %s699_s30  ;;  %s432_s22 = sadd.s32 8192, %s811_s5 }
  0x15   : > { %v290_v37 = vmul.u32 2146121005, %v289_v29  ;;  %v311_v42 = vmul.u32 2146121005, %v310_v34  ;;  %v331_v43 = vxor.u32 %v330_v35, %v329_v27  ;;  %v391_v48 = vstv %s390_s14  ;;  %s453_s21 = sadd.s32 9216, %s811_s5  ;;  %s474_s23 = sadd.s32 10240, %s811_s5 }
  0x16   : > { %v263_v9 = vmul.f32 0.07692308, %v809_v7  ;;  %v281_v11 = vmul.f32 0.15384616, %v809_v7  ;;  %v302_v14 = vmul.f32 0.23076923, %v809_v7  ;;  %v352_v54 = vxor.u32 %v351_v46, %v350_v38 }
  0x17   : > { %v323_v16 = vmul.f32 0.30769232, %v809_v7  ;;  %v344_v28 = vmul.f32 0.3846154, %v809_v7  ;;  %v365_v31 = vmul.f32 0.46153846, %v809_v7  ;;  %v392_v56 = vadd.s32 %v391_v48, %v806_v6 }
  0x18   : > { %v264_v17 = vadd.f32 %v263_v9, %v804_v4  ;;  %v282_v19 = vadd.f32 %v281_v11, %v804_v4  ;;  %v303_v22 = vadd.f32 %v302_v14, %v804_v4  ;;  %v271_v41 = vshrl.u32 %v270_v33, 15  ;;  %s495_s24 = sadd.s32 11264, %s811_s5 }
  0x19   : > { %v324_v23 = vadd.f32 %v323_v16, %v804_v4  ;;  %v345_v36 = vadd.f32 %v344_v28, %v804_v4  ;;  %v366_v39 = vadd.f32 %v365_v31, %v804_v4  ;;  %v386_v44 = vmul.f32 0.53846157, %v809_v7 }
  0x1a   : > { %265 = vst [vmem:[%s825_s11] sm:$0xff] %v264_v17  ;;  %664 = vst [vmem:[%s825_s11 + $0x8] sm:$0xff] %v282_v19  ;;  %v291_v45 = vshrl.u32 %v290_v37, 15  ;;  %v372_v47 = vshrl.u32 %v371_v40, 16  ;;  %v272_v49 = vxor.u32 %v271_v41, %v270_v33  ;;  %v312_v50 = vshrl.u32 %v311_v42, 15 }
  0x1b   : > { %667 = vst [vmem:[%s825_s11 + $0x10] sm:$0xff] %v303_v22  ;;  %670 = vst [vmem:[%s825_s11 + $0x18] sm:$0xff] %v324_v23  ;;  %v332_v51 = vmul.u32 2146121005, %v331_v43  ;;  %v387_v52 = vadd.f32 %v386_v44, %v804_v4  ;;  %v407_v60 = vmul.f32 0.61538464, %v809_v7  ;;  %v412_v0 = vstv %s411_s15 }
  0x1c   : > { %673 = vst [vmem:[%s825_s11 + $0x20] sm:$0xff] %v345_v36  ;;  %676 = vst [vmem:[%s825_s11 + $0x28] sm:$0xff] %v366_v39  ;;  %v292_v53 = vxor.u32 %v291_v45, %v290_v37  ;;  %v373_v55 = vxor.u32 %v372_v47, %v371_v40  ;;  %v273_v57 = vmul.u32 2221713035, %v272_v49  ;;  %v313_v58 = vxor.u32 %v312_v50, %v311_v42 }
  0x1d   : > { %v333_v59 = vshrl.u32 %v332_v51, 15  ;;  %679 = vst [vmem:[%s825_s11 + $0x30] sm:$0xff] %v387_v52  ;;  %v353_v62 = vmul.u32 2146121005, %v352_v54  ;;  %v393_v63 = vshrl.u32 %v392_v56, 16  ;;  %v408_v11 = vadd.f32 %v407_v60, %v804_v4 }
  0x1e   : > { %v293_v61 = vmul.u32 2221713035, %v292_v53  ;;  %v274_v1 = vshrl.u32 %v273_v57, 16  ;;  %v314_v2 = vmul.u32 2221713035, %v313_v58  ;;  %v413_v19 = vadd.s32 %v412_v0, %v806_v6 }
  0x1f   : > { %v334_v3 = vxor.u32 %v333_v59, %v332_v51  ;;  %v374_v5 = vmul.u32 2146121005, %v373_v55  ;;  %v354_v9 = vshrl.u32 %v353_v62, 15  ;;  %v394_v10 = vxor.u32 %v393_v63, %v392_v56  ;;  %682 = vst [vmem:[%s825_s11 + $0x38] sm:$0xff] %v408_v11 }
  0x20   : > { %v294_v8 = vshrl.u32 %v293_v61, 16  ;;  %v275_v12 = vxor.u32 %v274_v1, %v273_v57  ;;  %v315_v13 = vshrl.u32 %v314_v2, 16  ;;  %v414_v27 = vshrl.u32 %v413_v19, 16 }
  0x21   : > { %v335_v14 = vmul.u32 2221713035, %v334_v3  ;;  %v375_v15 = vshrl.u32 %v374_v5, 15  ;;  %v355_v17 = vxor.u32 %v354_v9, %v353_v62  ;;  %v395_v18 = vmul.u32 2146121005, %v394_v10 }
  0x22   : > { %v295_v16 = vxor.u32 %v294_v8, %v293_v61  ;;  %v276_v20 = vshrl.u32 %v275_v12, 9  ;;  %v316_v21 = vxor.u32 %v315_v13, %v314_v2  ;;  %v415_v35 = vxor.u32 %v414_v27, %v413_v19 }
  0x23   : > { %v336_v22 = vshrl.u32 %v335_v14, 16  ;;  %v376_v23 = vxor.u32 %v375_v15, %v374_v5  ;;  %v356_v25 = vmul.u32 2221713035, %v355_v17  ;;  %v396_v26 = vshrl.u32 %v395_v18, 15 }
  0x24   : > { %v296_v24 = vshrl.u32 %v295_v16, 9  ;;  %v277_v28 = vor.u32 1065353216, %v276_v20  ;;  %v317_v29 = vshrl.u32 %v316_v21, 9  ;;  %v416_v43 = vmul.u32 2146121005, %v415_v35 }
  0x25   : > { %v337_v30 = vxor.u32 %v336_v22, %v335_v14  ;;  %v377_v31 = vmul.u32 2221713035, %v376_v23  ;;  %v357_v33 = vshrl.u32 %v356_v25, 16  ;;  %v397_v34 = vxor.u32 %v396_v26, %v395_v18 }
  0x26   : > { %v297_v32 = vor.u32 1065353216, %v296_v24  ;;  %v663_v36 = vadd.f32 -1.0, %v277_v28  ;;  %v318_v37 = vor.u32 1065353216, %v317_v29  ;;  %v428_v47 = vmul.f32 0.6923077, %v809_v7 }
  0x27   : > { %v338_v38 = vshrl.u32 %v337_v30, 9  ;;  %v378_v39 = vshrl.u32 %v377_v31, 16  ;;  %v358_v41 = vxor.u32 %v357_v33, %v356_v25  ;;  %v398_v42 = vmul.u32 2221713035, %v397_v34 }
  0x28   : > { %v665_v40 = vadd.f32 -1.0, %v297_v32  ;;  %280 = vst [vmem:[%s865_s20] sm:$0xff] %v663_v36  ;;  %v668_v44 = vadd.f32 -1.0, %v318_v37  ;;  %v417_v50 = vshrl.u32 %v416_v43, 15  ;;  %v433_v51 = vstv %s432_s22 }
  0x29   : > { %v339_v45 = vor.u32 1065353216, %v338_v38  ;;  %v379_v46 = vxor.u32 %v378_v39, %v377_v31  ;;  %v359_v48 = vshrl.u32 %v358_v41, 9  ;;  %v399_v49 = vshrl.u32 %v398_v42, 16 }
  0x2a   : > { %666 = vst [vmem:[%s865_s20 + $0x8] sm:$0xff] %v665_v40  ;;  %669 = vst [vmem:[%s865_s20 + $0x10] sm:$0xff] %v668_v44  ;;  %v429_v54 = vadd.f32 %v428_v47, %v804_v4  ;;  %v434_v55 = vadd.s32 %v433_v51, %v806_v6  ;;  %v418_v58 = vxor.u32 %v417_v50, %v416_v43  ;;  %v449_v59 = vmul.f32 0.7692308, %v809_v7 }
  0x2b   : > { %v671_v52 = vadd.f32 -1.0, %v339_v45  ;;  %v380_v53 = vshrl.u32 %v379_v46, 9  ;;  %v360_v56 = vor.u32 1065353216, %v359_v48  ;;  %v400_v57 = vxor.u32 %v399_v49, %v398_v42 }
  0x2c   : > { %685 = vst [vmem:[%s825_s11 + $0x40] sm:$0xff] %v429_v54  ;;  %v435_v61 = vshrl.u32 %v434_v55, 16  ;;  %v454_v62 = vstv %s453_s21  ;;  %v470_v63 = vmul.f32 0.84615386, %v809_v7  ;;  %v419_v2 = vmul.u32 2221713035, %v418_v58 }
  0x2d   : > { %672 = vst [vmem:[%s865_s20 + $0x18] sm:$0xff] %v671_v52  ;;  %v381_v60 = vor.u32 1065353216, %v380_v53  ;;  %v674_v0 = vadd.f32 -1.0, %v360_v56  ;;  %v401_v1 = vshrl.u32 %v400_v57, 9  ;;  %v450_v3 = vadd.f32 %v449_v59, %v804_v4 }
  0x2e   : > { %v436_v8 = vxor.u32 %v435_v61, %v434_v55  ;;  %v455_v9 = vadd.s32 %v454_v62, %v806_v6  ;;  %v471_v10 = vadd.f32 %v470_v63, %v804_v4  ;;  %v420_v12 = vshrl.u32 %v419_v2, 16 }
  0x2f   : > { %v677_v5 = vadd.f32 -1.0, %v381_v60  ;;  %675 = vst [vmem:[%s865_s20 + $0x20] sm:$0xff] %v674_v0  ;;  %v402_v11 = vor.u32 1065353216, %v401_v1  ;;  %688 = vst [vmem:[%s825_s11 + $0x48] sm:$0xff] %v450_v3  ;;  %v475_v13 = vstv %s474_s23  ;;  %v491_v14 = vmul.f32 0.9230769, %v809_v7 }
  0x30   : > { %v437_v15 = vmul.u32 2146121005, %v436_v8  ;;  %v456_v16 = vshrl.u32 %v455_v9, 16  ;;  %691 = vst [vmem:[%s825_s11 + $0x50] sm:$0xff] %v471_v10  ;;  %v476_v17 = vadd.s32 %v475_v13, %v806_v6  ;;  %v496_v18 = vstv %s495_s24 }
  0x31   : > { %678 = vst [vmem:[%s865_s20 + $0x28] sm:$0xff] %v677_v5  ;;  %v680_v19 = vadd.f32 -1.0, %v402_v11  ;;  %v421_v20 = vxor.u32 %v420_v12, %v419_v2  ;;  %v492_v21 = vadd.f32 %v491_v14, %v804_v4  ;;  %v497_v22 = vadd.s32 %v496_v18, %v806_v6 }
  0x32   : > { %v438_v23 = vshrl.u32 %v437_v15, 15  ;;  %v457_v24 = vxor.u32 %v456_v16, %v455_v9  ;;  %v477_v25 = vshrl.u32 %v476_v17, 16 }
  0x33   : > { %681 = vst [vmem:[%s865_s20 + $0x30] sm:$0xff] %v680_v19  ;;  %v422_v26 = vshrl.u32 %v421_v20, 9  ;;  %694 = vst [vmem:[%s825_s11 + $0x58] sm:$0xff] %v492_v21  ;;  %v498_v7 = vshrl.u32 %v497_v22, 16 }
  0x34   : > { %v439_v27 = vxor.u32 %v438_v23, %v437_v15  ;;  %v458_v28 = vmul.u32 2146121005, %v457_v24  ;;  %v478_v29 = vxor.u32 %v477_v25, %v476_v17 }
  0x35   : > { %v423_v30 = vor.u32 1065353216, %v422_v26  ;;  %v499_v31 = vxor.u32 %v498_v7, %v497_v22 }
  0x36   : > { %v440_v32 = vmul.u32 2221713035, %v439_v27  ;;  %v459_v33 = vshrl.u32 %v458_v28, 15  ;;  %v479_v34 = vmul.u32 2146121005, %v478_v29 }
  0x37   : > { %v683_v35 = vadd.f32 -1.0, %v423_v30  ;;  %v500_v4 = vmul.u32 2146121005, %v499_v31 }
  0x38   : > { %v441_v36 = vshrl.u32 %v440_v32, 16  ;;  %v460_v6 = vxor.u32 %v459_v33, %v458_v28  ;;  %v480_v37 = vshrl.u32 %v479_v34, 15 }
  0x39   : > { %684 = vst [vmem:[%s865_s20 + $0x38] sm:$0xff] %v683_v35  ;;  %v501_v38 = vshrl.u32 %v500_v4, 15 }
  0x3a   : > { %v442_v39 = vxor.u32 %v441_v36, %v440_v32  ;;  %v461_v40 = vmul.u32 2221713035, %v460_v6  ;;  %v481_v41 = vxor.u32 %v480_v37, %v479_v34 }
  0x3b   : > { %v502_v42 = vxor.u32 %v501_v38, %v500_v4 }
  0x3c   : > { %v443_v43 = vshrl.u32 %v442_v39, 9  ;;  %v462_v44 = vshrl.u32 %v461_v40, 16  ;;  %v482_v45 = vmul.u32 2221713035, %v481_v41 }
  0x3d   : > { %v503_v46 = vmul.u32 2221713035, %v502_v42 }
  0x3e   : > { %v444_v47 = vor.u32 1065353216, %v443_v43  ;;  %v463_v48 = vxor.u32 %v462_v44, %v461_v40  ;;  %v483_v49 = vshrl.u32 %v482_v45, 16 }
  0x3f   : > { %v504_v50 = vshrl.u32 %v503_v46, 16 }
  0x40   : > { %v686_v51 = vadd.f32 -1.0, %v444_v47  ;;  %v464_v52 = vshrl.u32 %v463_v48, 9  ;;  %v484_v53 = vxor.u32 %v483_v49, %v482_v45 }
  0x41   : > { %v505_v54 = vxor.u32 %v504_v50, %v503_v46 }
  0x42   : > { %687 = vst [vmem:[%s865_s20 + $0x40] sm:$0xff] %v686_v51  ;;  %v465_v55 = vor.u32 1065353216, %v464_v52  ;;  %v485_v56 = vshrl.u32 %v484_v53, 9 }
  0x43   : > { %v506_v57 = vshrl.u32 %v505_v54, 9 }
  0x44   : > { %v689_v58 = vadd.f32 -1.0, %v465_v55  ;;  %v486_v59 = vor.u32 1065353216, %v485_v56 }
  0x45   : > { %v507_v60 = vor.u32 1065353216, %v506_v57 }
  0x46   : > { %690 = vst [vmem:[%s865_s20 + $0x48] sm:$0xff] %v689_v58  ;;  %v692_v61 = vadd.f32 -1.0, %v486_v59 }
  0x47   : > { %v695_v62 = vadd.f32 -1.0, %v507_v60 }
  0x48   : > { %693 = vst [vmem:[%s865_s20 + $0x50] sm:$0xff] %v692_v61 }
  0x49   : > { %696 = vst [vmem:[%s865_s20 + $0x58] sm:$0xff] %v695_v62 }
  0x4a PF: > { %s16_s19 = sadd.s32 1, %s746_s19   ;;  %s913_s17 = smov %s742_s18 }
  0x4b   : > { %p13_p5 = scmp.ge.s32.totalorder %s16_s19, 4   ;;  %s914_s18 = smov %s916_s0 }
  0x4d   :  { %15 = sbr.rel (!%p13_p5) target bundleno = 2 (0x2), region = 95 }

</bundles_post_ra>
